<compile_context>
chip_gen: v7x
topology: tpu7x:2x2x1
jax: 0.10.0
libtpu: 0.0.40
codegen_flags: <defaults>
</compile_context>

<pallas_src>
import jax
import jax.numpy as jnp
from jax.experimental import pallas as pl
from jax.experimental.pallas import tpu as pltpu


def _div_kernel(x_ref, v_ref, o_ref):
    # x_ref: (TILE_R, W) orig_dtype, v_ref: (1, W) f32 (tiled divisor row),
    # o_ref: (TILE_R, W) orig_dtype.  Widen in-register, true divide, cast back.
    x = x_ref[...].astype(jnp.float32)
    o_ref[...] = (x / v_ref[...]).astype(o_ref.dtype)


def _round_up(n, m):
    return ((n + m - 1) // m) * m


def _pick_config():
    """(tile_rows, vmem_limit_bytes) per TPU generation."""
    try:
        kind = jax.devices()[0].device_kind.lower()
    except Exception:
        kind = ""
    if "v5" in kind or "v6" in kind:
        # 128 MiB physical VMEM: 2048x1536 f32 blocks (12 MiB), ~48 MiB double-buffered.
        return 2048, 96 * 1024 * 1024
    # v7x (64 MiB physical VMEM) or unknown: 1024x1536 f32 blocks (6 MiB),
    # ~24 MiB double-buffered in+out -> comfortable headroom.
    return 1024, 40 * 1024 * 1024


def div_module_forward(x, v, *, lane_width=1536, min_pallas_bytes=1 << 18,
                       force_pallas=False):
    """Elementwise x / v with trailing-axis broadcasting (PyTorch semantics)."""
    orig_shape = x.shape
    orig_dtype = x.dtype
    last = v.shape[0]
    assert orig_shape[-1] == last, "last dim must match divisor vector length"

    n = x.size
    # Tiny inputs: pallas_call launch overhead dwarfs a handful of divides.
    # Same math (f32 divide, cast back) as the kernel path for consistency.
    if not force_pallas and n * jnp.dtype(orig_dtype).itemsize < min_pallas_bytes:
        return (x.astype(jnp.float32) / v.astype(jnp.float32)).astype(orig_dtype)

    W = lane_width
    assert W % 384 == 0, "lane width must be a multiple of lcm(3, 128) = 384"

    tile_cfg, vmem_limit = _pick_config()

    rows = -(-n // W)
    rows_pad = _round_up(rows, 8)          # only sublane-align; edge block is masked
    n_pad = rows_pad * W

    tile_r = tile_cfg
    if rows_pad < 2 * tile_r and rows_pad >= 16:
        # Medium inputs: keep >= 2 grid steps so both v7x TensorCores get work.
        tile_r = _round_up(-(-rows_pad // 2), 8)
    tile_r = max(8, min(tile_r, rows_pad))
    num_tiles = -(-rows_pad // tile_r)

    # No dtype conversion here: the kernel reads/writes orig_dtype directly.
    x_flat = x.reshape(-1)
    if n_pad > n:
        x_flat = jnp.pad(x_flat, (0, n_pad - n))
    x2 = x_flat.reshape(rows_pad, W)

    # W % 3 == 0, so flat index r*W + c has divisor v[c % 3] for every row.
    v_row = jnp.tile(v.astype(jnp.float32), W // last).reshape(1, W)

    out = pl.pallas_call(
        _div_kernel,
        out_shape=jax.ShapeDtypeStruct((rows_pad, W), orig_dtype),
        grid_spec=pl.GridSpec(
            grid=(num_tiles,),
            in_specs=[
                pl.BlockSpec((tile_r, W), lambda i: (i, 0)),
                pl.BlockSpec((1, W), lambda i: (0, 0)),   # fetched once (constant map)
            ],
            out_specs=pl.BlockSpec((tile_r, W), lambda i: (i, 0)),
        ),
        compiler_params=pltpu.CompilerParams(
            dimension_semantics=("parallel",),
            vmem_limit_bytes=vmem_limit,
        ),
    )(x2, v_row)

    if n_pad > n:
        return out.reshape(-1)[:n].reshape(orig_shape)
    return out.reshape(orig_shape)


if __name__ == "__main__":
    key = jax.random.PRNGKey(0)
    # Small shape consistent with the module: last dim must be 3 to broadcast
    # against self.v = [9.0, -2.0, -7.0].
    x = jax.random.normal(key, (2, 4, 8, 3), dtype=jnp.float32)
    v = jnp.array([9.0, -2.0, -7.0], dtype=jnp.float32)

    # Exercise the Pallas kernel path even at this small size.
    y = div_module_forward(x, v, force_pallas=True)
    jax.block_until_ready(y)

    # Correctness check against plain JAX reference.
    y_ref = x / v
    assert y.shape == x.shape and y.dtype == x.dtype
    assert jnp.allclose(y, y_ref, rtol=1e-6, atol=1e-6), "mismatch vs reference"

    # Small-input fast path keeps the same semantics.
    y_small = div_module_forward(x, v)
    assert jnp.allclose(y_small, y_ref, rtol=1e-6, atol=1e-6)

    print("KERNEL_OK")
</pallas_src>

<mosaic_0001>
module attributes {stable_mosaic.version = 11 : i64} {
  func.func @_div_kernel(%arg0: i32, %arg1: memref<8x1536xf32, #tpu.memory_space<vmem>>, %arg2: memref<1x1536xf32, #tpu.memory_space<vmem>>, %arg3: memref<8x1536xf32, #tpu.memory_space<vmem>>) attributes {dimension_semantics = [#tpu.dimension_semantics<parallel>], iteration_bounds = array<i64: 1>, scalar_prefetch = 0 : i64, scratch_operands = 0 : i64, tpu.core_type = #tpu.core_type<tc>, window_params = [{transform_indices = @transform_0, window_bounds = array<i64: 8, 1536>}, {pipeline_mode = #tpu.pipeline_mode<synchronous>, transform_indices = @transform_1, window_bounds = array<i64: 1, 1536>}, {transform_indices = @transform_2, window_bounds = array<i64: 8, 1536>}]} {
    %c0 = arith.constant 0 : index
    %c0_0 = arith.constant 0 : index
    %0 = vector.load %arg1[%c0, %c0_0] : memref<8x1536xf32, #tpu.memory_space<vmem>>, vector<8x1536xf32>
    %c0_1 = arith.constant 0 : index
    %c0_2 = arith.constant 0 : index
    %1 = vector.load %arg2[%c0_1, %c0_2] : memref<1x1536xf32, #tpu.memory_space<vmem>>, vector<1x1536xf32>
    %2 = vector.broadcast %1 : vector<1x1536xf32> to vector<8x1536xf32>
    %3 = arith.divf %0, %2 : vector<8x1536xf32>
    %c0_3 = arith.constant 0 : index
    %c0_4 = arith.constant 0 : index
    %4 = vector.load %arg3[%c0_3, %c0_4] : memref<8x1536xf32, #tpu.memory_space<vmem>>, vector<8x1536xf32>
    tpu.vector_store %arg3[%c0_3, %c0_4], %3 {strides = array<i32>} : memref<8x1536xf32, #tpu.memory_space<vmem>>, vector<8x1536xf32>,
    return
  }
  func.func @transform_0(%arg0: i32) -> (i32, i32) {
    %c0_i32 = arith.constant 0 : i32
    %c0_i32_0 = arith.constant 0 : i32
    return %arg0, %c0_i32 : i32, i32
  }
  func.func @transform_1(%arg0: i32) -> (i32, i32) {
    %c0_i32 = arith.constant 0 : i32
    %c0_i32_0 = arith.constant 0 : i32
    %c0_i32_1 = arith.constant 0 : i32
    return %c0_i32, %c0_i32_0 : i32, i32
  }
  func.func @transform_2(%arg0: i32) -> (i32, i32) {
    %c0_i32 = arith.constant 0 : i32
    %c0_i32_0 = arith.constant 0 : i32
    return %arg0, %c0_i32 : i32, i32
  }
}

</mosaic_0001>

<bundles_post_ra>
// kernel: tpu_custom_call.1
= control target key start
LH: loop header
LB: loop body
LE: loop exit
PB: predicated region body
PF: predicated region fallthrough
CT: control target
= control target key end

     0   :  { %7 = vsyncpa [#allocation3], 0  ;;  %s317_s0 = inlined_call_operand.hbm [shape: f32[8,1536], index: 0, kind: input, shape index: {}]   ;;  %s318_s1 = inlined_call_operand.hbm [shape: f32[1,1536], index: 1, kind: input, shape index: {}]   ;;  %s319_s2 = inlined_call_operand.hbm [shape: f32[8,1536], index: 2, kind: output, shape index: {}]  }
   0x1   :  { %8 = vsyncpa [#allocation6], 0 }
   0x2   :  { %9 = vsyncpa [#allocation4], 0  ;;  %s263_s9 = smov [#allocation2]   ;;  %s264_s11 = smov [#allocation5]  }
   0x3   :  { %s16_s10 = sshll.u32 %s263_s9, 4  ;;  %s26_s12 = sshll.u32 %s264_s11, 4  ;;  %s17_s10 = int_to_ptr.vmem [resolvable:$true] %s16_s10  ;;  %s27_s12 = int_to_ptr.vmem [resolvable:$true] %s26_s12 }
   0x4   :  { %s191_s15 = scalar_lea.hbm %s317_s0, 1536 }
   0x5   :  { %p192_p0 = scmp.ne.s32.totalorder %s317_s0, %s191_s15  ;;  %p195_p1 = scmp.lt.u32.totalorder %s191_s15, %s317_s0 }
   0x7   :  { %p197_p2 = pnand %p195_p1, %p192_p0 }
   0x9   :  { %200 = shalt.err (!%p197_p2)
}
   0xa   :  { %s201_s20 = scalar_lea.vmem %s17_s10, 1536  ;;  %p206_p4 = scmp.lt.s32.totalorder %s17_s10, %s17_s10 }
   0xb   :  { %p202_p3 = scmp.ne.s32.totalorder %s17_s10, %s201_s20  ;;  %p207_p5 = scmp.lt.s32.totalorder %s201_s20, %s201_s20 }
   0xd   :  { %p208_p6 = por %p207_p5, %p206_p4 }
   0xf   :  { %p209_p7 = pnand %p208_p6, %p202_p3 }
  0x11   :  { %212 = shalt.err (!%p209_p7)
}
  0x12   :  { %19 = dma.hbm_to_vmem [thread:$0]  %s317_s0, 1536, %s17_s10, [#allocation3]  }
  0x13   :  { %s213_s25 = scalar_lea.hbm %s318_s1, 192 }
  0x14   :  { %p214_p8 = scmp.ne.s32.totalorder %s318_s1, %s213_s25  ;;  %p217_p9 = scmp.lt.u32.totalorder %s213_s25, %s318_s1 }
  0x16   :  { %p219_p10 = pnand %p217_p9, %p214_p8 }
  0x18   :  { %222 = shalt.err (!%p219_p10)
}
  0x19   :  { %s223_s30 = scalar_lea.vmem %s27_s12, 192  ;;  %p228_p12 = scmp.lt.s32.totalorder %s27_s12, %s27_s12 }
  0x1a   :  { %p224_p11 = scmp.ne.s32.totalorder %s27_s12, %s223_s30  ;;  %p229_p13 = scmp.lt.s32.totalorder %s223_s30, %s223_s30 }
  0x1c   :  { %p230_p0 = por %p229_p13, %p228_p12 }
  0x1e   :  { %p231_p1 = pnand %p230_p0, %p224_p11 }
  0x20   :  { %234 = shalt.err (!%p231_p1)
}
  0x21   :  { %29 = dma.hbm_to_vmem [thread:$0]  %s318_s1, 192, %s27_s12, [#allocation6]  }
  0x22   :  { %257 = dma.done.wait [#allocation3], 1536  }
  0x23   :  { %258 = vsyncadd [#allocation3], 4294965760 }
  0x24   :  { %259 = dma.done.wait [#allocation6], 192  }
  0x25   :  { %260 = vsyncadd [#allocation6], 4294967104  ;;  %v52_v0 = vlaneseq  ;;  %v48_v7 = vld [vmem:[#allocation5] sm:$0xff]  ;;  %v49_v17 = vld [vmem:[#allocation5 + $0x8] sm:$0xf]  ;;  %s265_s1 = smov [#allocation7]  }
  0x26   :  { %v36_v24 = vld [vmem:[#allocation2] sm:$0xff]  ;;  %v37_v25 = vld [vmem:[#allocation2 + $0x8] sm:$0xff]  ;;  %v38_v27 = vld [vmem:[#allocation2 + $0x10] sm:$0xff]  ;;  %s154_s4 = sshll.u32 %s265_s1, 4  ;;  %s155_s4 = int_to_ptr.vmem [resolvable:$true] %s154_s4 }
  0x27   :  { %v53_v1 = vshrl.u32 %v52_v0, 7  ;;  %v39_v30 = vld [vmem:[#allocation2 + $0x18] sm:$0xff]  ;;  %v40_v33 = vld [vmem:[#allocation2 + $0x20] sm:$0xff]  ;;  %v41_v36 = vld [vmem:[#allocation2 + $0x28] sm:$0xff]  ;;  %s235_s5 = scalar_lea.vmem %s155_s4, 1536  ;;  %p240_p3 = scmp.lt.s32.totalorder %s155_s4, %s155_s4 }
  0x28   :  { %v42_v39 = vld [vmem:[#allocation2 + $0x30] sm:$0xff]  ;;  %v43_v42 = vld [vmem:[#allocation2 + $0x38] sm:$0xff]  ;;  %v44_v45 = vld [vmem:[#allocation2 + $0x40] sm:$0xff]  ;;  %p236_p2 = scmp.ne.s32.totalorder %s155_s4, %s235_s5  ;;  %p241_p4 = scmp.lt.s32.totalorder %s235_s5, %s235_s5 }
  0x29   :  { %v54_v2 = vsub.s32 0, %v53_v1  ;;  %v58_v3 = vsub.s32 1, %v53_v1  ;;  %v62_v4 = vsub.s32 2, %v53_v1  ;;  %v66_v5 = vsub.s32 3, %v53_v1  ;;  %v45_v48 = vld [vmem:[#allocation2 + $0x48] sm:$0xff]  ;;  %v46_v51 = vld [vmem:[#allocation2 + $0x50] sm:$0xff] }
  0x2a   :  { %v70_v6 = vsub.s32 4, %v53_v1  ;;  %v74_v8 = vsub.s32 5, %v53_v1  ;;  %v78_v12 = vsub.s32 6, %v53_v1  ;;  %v82_v14 = vsub.s32 7, %v53_v1  ;;  %v47_v54 = vld [vmem:[#allocation2 + $0x58] sm:$0xff]  ;;  %p242_p5 = por %p241_p4, %p240_p3 }
  0x2b   :  { %v55_v9 = vrot.slane %v48_v7, %v54_v2  ;;  %v59_v10 = vrot.slane %v48_v7, %v58_v3  ;;  %v63_v11 = vrot.slane %v48_v7, %v62_v4  ;;  %v67_v13 = vrot.slane %v48_v7, %v66_v5 }
  0x2c   :  { %v71_v15 = vrot.slane %v48_v7, %v70_v6  ;;  %v75_v16 = vrot.slane %v48_v7, %v74_v8  ;;  %v79_v18 = vrot.slane %v48_v7, %v78_v12  ;;  %v83_v19 = vrot.slane %v48_v7, %v82_v14  ;;  %p243_p6 = pnand %p242_p5, %p236_p2 }
  0x2d   :  { %167 = vrcp.f32 %v55_v9  ;;  %v87_v20 = vrot.slane %v49_v17, %v54_v2  ;;  %v91_v21 = vrot.slane %v49_v17, %v58_v3  ;;  %v95_v22 = vrot.slane %v49_v17, %v62_v4 }
  0x2e   :  { %169 = vrcp.f32 %v59_v10  ;;  %v99_v23 = vrot.slane %v49_v17, %v66_v5 }
  0x2f   :  { %171 = vrcp.f32 %v63_v11 }
  0x30   :  { %173 = vrcp.f32 %v67_v13 }
  0x31   :  { %175 = vrcp.f32 %v71_v15 }
  0x32   :  { %177 = vrcp.f32 %v75_v16 }
  0x33   :  { %179 = vrcp.f32 %v79_v18 }
  0x34   :  { %181 = vrcp.f32 %v83_v19 }
  0x35   :  { %183 = vrcp.f32 %v87_v20 }
  0x36   :  { %185 = vrcp.f32 %v91_v21 }
  0x37   :  { %v168_v26 = vpop.eup %167  ;;  %187 = vrcp.f32 %v95_v22 }
  0x38   :  { %v170_v28 = vpop.eup %169  ;;  %v113_v29 = vmul.f32 %v168_v26, %v36_v24  ;;  %189 = vrcp.f32 %v99_v23 }
  0x39   :  { %v172_v31 = vpop.eup %171  ;;  %v115_v32 = vmul.f32 %v170_v28, %v37_v25 }
  0x3a   :  { %v174_v34 = vpop.eup %173  ;;  %136 = vst [vmem:[#allocation7] sm:$0xff] %v113_v29  ;;  %v117_v35 = vmul.f32 %v172_v31, %v38_v27 }
  0x3b   :  { %v176_v37 = vpop.eup %175  ;;  %137 = vst [vmem:[#allocation7 + $0x8] sm:$0xff] %v115_v32  ;;  %v119_v38 = vmul.f32 %v174_v34, %v39_v30 }
  0x3c   :  { %v178_v40 = vpop.eup %177  ;;  %138 = vst [vmem:[#allocation7 + $0x10] sm:$0xff] %v117_v35  ;;  %v121_v41 = vmul.f32 %v176_v37, %v40_v33 }
  0x3d   :  { %v180_v43 = vpop.eup %179  ;;  %139 = vst [vmem:[#allocation7 + $0x18] sm:$0xff] %v119_v38  ;;  %v123_v44 = vmul.f32 %v178_v40, %v41_v36 }
  0x3e   :  { %v182_v46 = vpop.eup %181  ;;  %140 = vst [vmem:[#allocation7 + $0x20] sm:$0xff] %v121_v41  ;;  %v125_v47 = vmul.f32 %v180_v43, %v42_v39 }
  0x3f   :  { %v184_v49 = vpop.eup %183  ;;  %141 = vst [vmem:[#allocation7 + $0x28] sm:$0xff] %v123_v44  ;;  %v127_v50 = vmul.f32 %v182_v46, %v43_v42 }
  0x40   :  { %v186_v52 = vpop.eup %185  ;;  %142 = vst [vmem:[#allocation7 + $0x30] sm:$0xff] %v125_v47  ;;  %v129_v53 = vmul.f32 %v184_v49, %v44_v45 }
  0x41   :  { %v188_v55 = vpop.eup %187  ;;  %143 = vst [vmem:[#allocation7 + $0x38] sm:$0xff] %v127_v50  ;;  %v131_v56 = vmul.f32 %v186_v52, %v45_v48 }
  0x42   :  { %v190_v57 = vpop.eup %189  ;;  %144 = vst [vmem:[#allocation7 + $0x40] sm:$0xff] %v129_v53  ;;  %v133_v58 = vmul.f32 %v188_v55, %v46_v51 }
  0x43   :  { %145 = vst [vmem:[#allocation7 + $0x48] sm:$0xff] %v131_v56  ;;  %v135_v59 = vmul.f32 %v190_v57, %v47_v54 }
  0x44   :  { %146 = vst [vmem:[#allocation7 + $0x50] sm:$0xff] %v133_v58 }
  0x45   :  { %147 = vst [vmem:[#allocation7 + $0x58] sm:$0xff] %v135_v59 }
  0x46   :  { %246 = shalt.err (!%p243_p6)
}
  0x47   :  { %s247_s8 = scalar_lea.hbm %s319_s2, 1536 }
  0x48   :  { %p248_p7 = scmp.ne.s32.totalorder %s319_s2, %s247_s8  ;;  %p251_p8 = scmp.lt.u32.totalorder %s247_s8, %s319_s2 }
  0x4a   :  { %p253_p9 = pnand %p251_p8, %p248_p7 }
  0x4c   :  { %256 = shalt.err (!%p253_p9)
}
  0x4d   :  { %157 = dma.vmem_to_hbm [thread:$0]  %s155_s4, 1536, %s319_s2, [#allocation4]  }
  0x4e   :  { %261 = dma.done.wait [#allocation4], 1536  }
  0x4f   :  { %262 = vsyncadd [#allocation4], 4294965760 }
  0x50   :  { %161 = vsyncpa [#allocation3], 1 }
  0x51   :  { %162 = vsyncpa [#allocation6], 1 }
  0x52   :  { %163 = vsyncpa [#allocation4], 1 }

</bundles_post_ra>
